<compile_context>
chip_gen: v5e
topology: v5e:2x2
jax: 0.10.0
libtpu: 0.0.40
codegen_flags: <defaults>
</compile_context>

<pallas_src>
import jax
import jax.numpy as jnp
from jax.experimental import pallas as pl
from jax.experimental.pallas import tpu as pltpu


LANE = 128        # lane width (K dims and narrow-N padding)
TB_ALIGN = 16     # bf16 packs 16 sublanes per vreg -> 16-row-aligned batch tiles


def _round_up(x, m):
    return ((x + m - 1) // m) * m


# ---------------------------------------------------------------------------
# One-time hardware / feature introspection
# ---------------------------------------------------------------------------
def _default_vmem_limit_bytes():
    """Per-generation VMEM budget: ~85% of physical capacity.

    v5e/v6e report 128 MiB (-> ~109 MiB budget), v7x 64 MiB (-> ~54 MiB budget).
    The try/except here only guards the introspection call itself; the real
    pallas_call below is never wrapped.
    """
    try:
        cap = pltpu.get_tpu_info().vmem_capacity_bytes
        if cap:
            return int(cap * 0.85)
    except Exception:  # introspection fallback only (e.g. non-TPU backend)
        pass
    return 64 * 1024 * 1024


_BUFFERED_SUPPORT = None


def _buffered_supported():
    """One-time probe: does this JAX build accept and lower pipeline_mode=pl.Buffered(1)?

    The probe compiles a tiny kernel once; on failure we fall back to default
    double-buffering (and budget for it). The production pallas_call is not
    wrapped in any try/except.
    """
    global _BUFFERED_SUPPORT
    if _BUFFERED_SUPPORT is not None:
        return _BUFFERED_SUPPORT
    if not hasattr(pl, "Buffered"):
        _BUFFERED_SUPPORT = False
        return _BUFFERED_SUPPORT

    def _probe_kernel(x_ref, w_ref, o_ref):
        o_ref[...] = x_ref[...] + w_ref[...]

    try:
        probe = pl.pallas_call(
            _probe_kernel,
            out_shape=jax.ShapeDtypeStruct((16, 128), jnp.float32),
            grid=(2,),
            in_specs=[pl.BlockSpec((8, 128), lambda i: (i, 0)),
                      pl.BlockSpec((8, 128), lambda i: (0, 0),
                                   pipeline_mode=pl.Buffered(1))],
            out_specs=pl.BlockSpec((8, 128), lambda i: (i, 0)),
        )
        x = jnp.zeros((16, 128), jnp.float32)
        w = jnp.zeros((8, 128), jnp.float32)
        jax.jit(probe).lower(x, w).compile()
        _BUFFERED_SUPPORT = True
    except Exception:  # probe only; determines buffering mode once
        _BUFFERED_SUPPORT = False
    return _BUFFERED_SUPPORT


# ---------------------------------------------------------------------------
# Kernels (one grid axis over batch tiles; all weights resident in VMEM)
# ---------------------------------------------------------------------------
def _resnext_kernel_proj(x_ref, w1s_ref, b1s_ref, w2_ref, b2_ref,
                         w3_ref, b3_ref, o_ref):
    """out = fc3(fc2(fc1(x))) + shortcut_linear(x).

    fc1 and the shortcut are fused: w1s = [w1 | ws] along N, b1s = [b1 | bs].
    x_ref already holds the compute dtype (bf16 or f32); accumulation is f32.
    """
    out_p = w2_ref.shape[0]
    x = x_ref[...]
    y = jnp.dot(x, w1s_ref[...], preferred_element_type=jnp.float32) + b1s_ref[...]
    h = y[:, :out_p]          # fc1 output
    sc = y[:, out_p:]         # projection-shortcut output
    h = jnp.dot(h.astype(w2_ref.dtype), w2_ref[...],
                preferred_element_type=jnp.float32) + b2_ref[...]
    h = jnp.dot(h.astype(w3_ref.dtype), w3_ref[...],
                preferred_element_type=jnp.float32) + b3_ref[...]
    o_ref[...] = (h + sc).astype(o_ref.dtype)


def _resnext_kernel_identity(x_ref, w1_ref, b1_ref, w2_ref, b2_ref,
                             w3_ref, b3_ref, o_ref):
    """out = fc3(fc2(fc1(x))) + x  (in_features == out_features)."""
    x = x_ref[...]
    h = jnp.dot(x, w1_ref[...], preferred_element_type=jnp.float32) + b1_ref[...]
    h = jnp.dot(h.astype(w2_ref.dtype), w2_ref[...],
                preferred_element_type=jnp.float32) + b2_ref[...]
    h = jnp.dot(h.astype(w3_ref.dtype), w3_ref[...],
                preferred_element_type=jnp.float32) + b3_ref[...]
    # Residual is added in the compute dtype of x (bf16 by default); pass
    # weight_dtype=jnp.float32 for an exact f32 residual.
    o_ref[...] = (h + x.astype(jnp.float32)).astype(o_ref.dtype)


# ---------------------------------------------------------------------------
# Tile sizing
# ---------------------------------------------------------------------------
def _choose_tb(requested, B, bytes_per_row, resident_weight_bytes, vmem_limit_bytes):
    """Pick the batch tile: biggest that fits the VMEM budget, >=2 grid steps if possible."""
    if requested is not None:
        return max(TB_ALIGN, _round_up(int(requested), TB_ALIGN))
    # 128 MiB parts (v5e/v6e) can afford 1024-row tiles; 64 MiB (v7x) stays at 512.
    max_tb = 1024 if vmem_limit_bytes >= 80 * 1024 * 1024 else 512
    tb = min(_round_up(B, TB_ALIGN), max_tb)
    # Budget is consistent with the buffering actually requested (resident_weight_bytes
    # already includes the 1x / 2x factor).
    budget = int(0.8 * vmem_limit_bytes) - resident_weight_bytes
    while tb > TB_ALIGN and tb * bytes_per_row > budget:
        tb //= 2
    tb = max(TB_ALIGN, _round_up(tb, TB_ALIGN))
    # Guarantee >=2 grid steps when B allows it, so dimension_semantics=("parallel",)
    # shards batch tiles across v7x's 2 TensorCores (no effect on 1-TC v5e/v6e).
    if tb >= B and B >= 2 * TB_ALIGN:
        tb = _round_up(-(-B // 2), TB_ALIGN)
    return tb


# ---------------------------------------------------------------------------
# Wrapper
# ---------------------------------------------------------------------------
def resnext_block_forward(x, params, *, tb=None, weight_dtype=jnp.bfloat16,
                          out_dtype=None, vmem_limit_bytes=None):
    """ResNeXtBlock forward with a Pallas TPU kernel.

    x:      [B, in_features] (float32)
    params: dict with 'w1','b1','w2','b2','w3','b3' (+ 'ws','bs' if projecting);
            weights transposed to [F_in, F_out]; biases as [1, F_out].
    weight_dtype: bf16 by default (MXU fast path, f32 accumulation); pass
            jnp.float32 for bit-faithful f32 math including the residual.
    """
    B, in_f = x.shape
    out_f = params["w1"].shape[1]
    has_proj = "ws" in params
    if not has_proj and in_f != out_f:
        raise ValueError(
            f"params have no projection shortcut ('ws'/'bs') but in_features "
            f"({in_f}) != out_features ({out_f}); an identity shortcut requires "
            f"matching feature sizes.")

    if vmem_limit_bytes is None:
        vmem_limit_bytes = _default_vmem_limit_bytes()
    out_dtype = x.dtype if out_dtype is None else out_dtype
    compute_dtype = weight_dtype

    # Lane-dense feature padding. K dims pad to 128; the N (output) dim pads to
    # 256 once wide enough to be compute-bound so v6e/v7x 2x256 MXU passes run at
    # full column utilization (128 is kept in the small, HBM-bound regime; v5e's
    # 128x128 MXU only pays a little extra padding).
    n_align = 256 if out_f >= 512 else LANE
    out_p = _round_up(out_f, n_align)
    in_p = out_p if not has_proj else _round_up(in_f, LANE)

    def pad_w(w, rows, cols):
        w = jnp.pad(w, ((0, rows - w.shape[0]), (0, cols - w.shape[1])))
        return w.astype(weight_dtype)

    def pad_b(b, cols):
        return jnp.pad(b, ((0, 0), (0, cols - b.shape[1]))).astype(jnp.float32)

    if has_proj:
        # Fuse fc1 and the projection shortcut: same LHS, one MXU pass.
        w1s = jnp.concatenate([pad_w(params["w1"], in_p, out_p),
                               pad_w(params["ws"], in_p, out_p)], axis=1)
        b1s = jnp.concatenate([pad_b(params["b1"], out_p),
                               pad_b(params["bs"], out_p)], axis=1)
        kernel = _resnext_kernel_proj
    else:
        w1s = pad_w(params["w1"], in_p, out_p)
        b1s = pad_b(params["b1"], out_p)
        kernel = _resnext_kernel_identity
    w2, b2 = pad_w(params["w2"], out_p, out_p), pad_b(params["b2"], out_p)
    w3, b3 = pad_w(params["w3"], out_p, out_p), pad_b(params["b3"], out_p)

    # Resident weight footprint, consistent with the buffering we actually request.
    use_buffered = _buffered_supported()
    weight_buffer_count = 1 if use_buffered else 2
    wsize = jnp.dtype(weight_dtype).itemsize
    n1 = w1s.shape[1]
    weight_bytes = wsize * (in_p * n1 + 2 * out_p * out_p) + 4 * (n1 + 2 * out_p)
    resident_weight_bytes = weight_buffer_count * weight_bytes
    if resident_weight_bytes > int(0.9 * vmem_limit_bytes):
        # TODO(synk): for very large out_features, stream weight tiles with a
        # K/N-tiled grid (reduction axis last, "arbitrary") and an f32 VMEM
        # accumulator instead of keeping all weights resident.
        raise ValueError(
            f"ResNeXtBlock weights need ~{resident_weight_bytes / 2**20:.1f} MiB "
            f"resident VMEM ({weight_buffer_count}x buffering) but the budget is "
            f"{vmem_limit_bytes / 2**20:.1f} MiB; reduce out_features or implement "
            f"the weight-streaming path.")

    # Batch tile: per-row activation bytes (double-buffered x/out tiles + live
    # f32 intermediates of width ~3-4*out_p).
    cd = jnp.dtype(compute_dtype).itemsize
    od = jnp.dtype(out_dtype).itemsize
    inter_cols_f32 = (4 if has_proj else 3) * out_p
    bytes_per_row = 2 * in_p * cd + 2 * out_p * od + 4 * inter_cols_f32
    tb = _choose_tb(tb, B, bytes_per_row, resident_weight_bytes, vmem_limit_bytes)
    B_p = _round_up(B, tb)

    # Pad and cast x once in the wrapper (halves the x HBM read when bf16).
    xp = jnp.pad(x, ((0, B_p - B), (0, in_p - in_f))).astype(compute_dtype)

    wkw = {"pipeline_mode": pl.Buffered(1)} if use_buffered else {}

    def const_spec(shape):   # grid-invariant weight/bias block
        return pl.BlockSpec(shape, lambda i: (0, 0), **wkw)

    in_specs = [pl.BlockSpec((tb, in_p), lambda i: (i, 0)),
                const_spec(w1s.shape), const_spec(b1s.shape),
                const_spec((out_p, out_p)), const_spec((1, out_p)),
                const_spec((out_p, out_p)), const_spec((1, out_p))]

    out_pad = pl.pallas_call(
        kernel,
        out_shape=jax.ShapeDtypeStruct((B_p, out_p), out_dtype),
        grid=(B_p // tb,),
        in_specs=in_specs,
        out_specs=pl.BlockSpec((tb, out_p), lambda i: (i, 0)),
        compiler_params=pltpu.CompilerParams(
            dimension_semantics=("parallel",),   # batch tiles across v7x's 2 TCs
            vmem_limit_bytes=int(vmem_limit_bytes)),
    )(xp, w1s, b1s, w2, b2, w3, b3)

    return out_pad[:B, :out_f]


# ---------------------------------------------------------------------------
# Deterministic parameter init (mirrors nn.Linear's U(-1/sqrt(fan_in), +..))
# ---------------------------------------------------------------------------
def init_params(key, in_features, out_features):
    def linear(k, fan_in, fan_out):
        kw, kb = jax.random.split(k)
        bound = 1.0 / jnp.sqrt(fan_in)
        w = jax.random.uniform(kw, (fan_in, fan_out), jnp.float32, -bound, bound)
        b = jax.random.uniform(kb, (1, fan_out), jnp.float32, -bound, bound)
        return w, b

    k1, k2, k3, ks = jax.random.split(key, 4)
    p = {}
    p["w1"], p["b1"] = linear(k1, in_features, out_features)
    p["w2"], p["b2"] = linear(k2, out_features, out_features)
    p["w3"], p["b3"] = linear(k3, out_features, out_features)
    if in_features != out_features:
        p["ws"], p["bs"] = linear(ks, in_features, out_features)
    return p


def reference_forward(x, params):
    h = x @ params["w1"] + params["b1"]
    h = h @ params["w2"] + params["b2"]
    h = h @ params["w3"] + params["b3"]
    sc = x @ params["ws"] + params["bs"] if "ws" in params else x
    return h + sc


if __name__ == "__main__":
    # Shapes consistent with the module: in_features=32, out_features=64,
    # cardinality=8 -> group_width=8 (unused in forward, kept for fidelity).
    B, IN_F, OUT_F = 16, 32, 64
    cardinality = 8
    group_width = OUT_F // cardinality  # noqa: F841  (not used in forward)

    key = jax.random.PRNGKey(0)
    kx, kp, kp2 = jax.random.split(key, 3)
    x = jax.random.normal(kx, (B, IN_F), jnp.float32)
    params = init_params(kp, IN_F, OUT_F)
    ref = reference_forward(x, params)

    # Projection-shortcut case, bf16 compute (fast default path, fused fc1+shortcut).
    out = jax.block_until_ready(resnext_block_forward(x, params))
    assert out.shape == (B, OUT_F)
    assert jnp.allclose(out, ref, atol=5e-2, rtol=5e-2), "bf16 path mismatch"

    # Same case with f32 weights/activations: exact check of the kernel math.
    out_f32 = jax.block_until_ready(
        resnext_block_forward(x, params, weight_dtype=jnp.float32))
    assert jnp.allclose(out_f32, ref, atol=1e-4, rtol=1e-4), "f32 path mismatch"

    # Identity-shortcut case (in_features == out_features), f32 for exact residual.
    x2 = jax.random.normal(kx, (B, OUT_F), jnp.float32)
    params2 = init_params(kp2, OUT_F, OUT_F)
    out2 = jax.block_until_ready(
        resnext_block_forward(x2, params2, weight_dtype=jnp.float32))
    ref2 = reference_forward(x2, params2)
    assert jnp.allclose(out2, ref2, atol=1e-4, rtol=1e-4), "identity path mismatch"

    print("KERNEL_OK")
</pallas_src>

<mosaic_0001>
module attributes {stable_mosaic.version = 11 : i64} {
  func.func @_resnext_kernel_proj(%arg0: i32, %arg1: memref<16x128xbf16, #tpu.memory_space<vmem>>, %arg2: memref<128x256xbf16, #tpu.memory_space<vmem>>, %arg3: memref<1x256xf32, #tpu.memory_space<vmem>>, %arg4: memref<128x128xbf16, #tpu.memory_space<vmem>>, %arg5: memref<1x128xf32, #tpu.memory_space<vmem>>, %arg6: memref<128x128xbf16, #tpu.memory_space<vmem>>, %arg7: memref<1x128xf32, #tpu.memory_space<vmem>>, %arg8: memref<16x128xf32, #tpu.memory_space<vmem>>) attributes {dimension_semantics = [#tpu.dimension_semantics<parallel>], iteration_bounds = array<i64: 1>, scalar_prefetch = 0 : i64, scratch_operands = 0 : i64, tpu.core_type = #tpu.core_type<tc>, window_params = [{transform_indices = @transform_0, window_bounds = array<i64: 16, 128>}, {pipeline_mode = #tpu.pipeline_mode<synchronous>, transform_indices = @transform_1, window_bounds = array<i64: 128, 256>}, {pipeline_mode = #tpu.pipeline_mode<synchronous>, transform_indices = @transform_2, window_bounds = array<i64: 1, 256>}, {pipeline_mode = #tpu.pipeline_mode<synchronous>, transform_indices = @transform_3, window_bounds = array<i64: 128, 128>}, {pipeline_mode = #tpu.pipeline_mode<synchronous>, transform_indices = @transform_4, window_bounds = array<i64: 1, 128>}, {pipeline_mode = #tpu.pipeline_mode<synchronous>, transform_indices = @transform_5, window_bounds = array<i64: 128, 128>}, {pipeline_mode = #tpu.pipeline_mode<synchronous>, transform_indices = @transform_6, window_bounds = array<i64: 1, 128>}, {transform_indices = @transform_7, window_bounds = array<i64: 16, 128>}]} {
    %c0 = arith.constant 0 : index
    %c0_0 = arith.constant 0 : index
    %0 = vector.load %arg1[%c0, %c0_0] : memref<16x128xbf16, #tpu.memory_space<vmem>>, vector<16x128xbf16>
    %c0_1 = arith.constant 0 : index
    %c0_2 = arith.constant 0 : index
    %1 = vector.load %arg2[%c0_1, %c0_2] : memref<128x256xbf16, #tpu.memory_space<vmem>>, vector<128x256xbf16>
    %cst = arith.constant dense<0.000000e+00> : vector<16x256xf32>
    %2 = tpu.matmul %0, %1, %cst {dimension_numbers = #tpu.dot_dimension_numbers<[1], [0], [0], [1], [0, 0, 1, 1], [], []>} : vector<16x128xbf16>, vector<128x256xbf16>, vector<16x256xf32> -> vector<16x256xf32>
    %c0_3 = arith.constant 0 : index
    %c0_4 = arith.constant 0 : index
    %3 = vector.load %arg3[%c0_3, %c0_4] : memref<1x256xf32, #tpu.memory_space<vmem>>, vector<1x256xf32>
    %4 = vector.broadcast %3 : vector<1x256xf32> to vector<16x256xf32>
    %5 = arith.addf %2, %4 : vector<16x256xf32>
    %6 = vector.extract_strided_slice %5 {offsets = [0, 0], sizes = [16, 128], strides = [1, 1]} : vector<16x256xf32> to vector<16x128xf32>
    %7 = vector.extract_strided_slice %5 {offsets = [0, 128], sizes = [16, 128], strides = [1, 1]} : vector<16x256xf32> to vector<16x128xf32>
    %8 = arith.truncf %6 : vector<16x128xf32> to vector<16x128xbf16>
    %c0_5 = arith.constant 0 : index
    %c0_6 = arith.constant 0 : index
    %9 = vector.load %arg4[%c0_5, %c0_6] : memref<128x128xbf16, #tpu.memory_space<vmem>>, vector<128x128xbf16>
    %cst_7 = arith.constant dense<0.000000e+00> : vector<16x128xf32>
    %10 = tpu.matmul %8, %9, %cst_7 {dimension_numbers = #tpu.dot_dimension_numbers<[1], [0], [0], [1], [0, 0, 1, 1], [], []>} : vector<16x128xbf16>, vector<128x128xbf16>, vector<16x128xf32> -> vector<16x128xf32>
    %c0_8 = arith.constant 0 : index
    %c0_9 = arith.constant 0 : index
    %11 = vector.load %arg5[%c0_8, %c0_9] : memref<1x128xf32, #tpu.memory_space<vmem>>, vector<1x128xf32>
    %12 = vector.broadcast %11 : vector<1x128xf32> to vector<16x128xf32>
    %13 = arith.addf %10, %12 : vector<16x128xf32>
    %14 = arith.truncf %13 : vector<16x128xf32> to vector<16x128xbf16>
    %c0_10 = arith.constant 0 : index
    %c0_11 = arith.constant 0 : index
    %15 = vector.load %arg6[%c0_10, %c0_11] : memref<128x128xbf16, #tpu.memory_space<vmem>>, vector<128x128xbf16>
    %cst_12 = arith.constant dense<0.000000e+00> : vector<16x128xf32>
    %16 = tpu.matmul %14, %15, %cst_12 {dimension_numbers = #tpu.dot_dimension_numbers<[1], [0], [0], [1], [0, 0, 1, 1], [], []>} : vector<16x128xbf16>, vector<128x128xbf16>, vector<16x128xf32> -> vector<16x128xf32>
    %c0_13 = arith.constant 0 : index
    %c0_14 = arith.constant 0 : index
    %17 = vector.load %arg7[%c0_13, %c0_14] : memref<1x128xf32, #tpu.memory_space<vmem>>, vector<1x128xf32>
    %18 = vector.broadcast %17 : vector<1x128xf32> to vector<16x128xf32>
    %19 = arith.addf %16, %18 : vector<16x128xf32>
    %20 = arith.addf %19, %7 : vector<16x128xf32>
    %c0_15 = arith.constant 0 : index
    %c0_16 = arith.constant 0 : index
    %21 = vector.load %arg8[%c0_15, %c0_16] : memref<16x128xf32, #tpu.memory_space<vmem>>, vector<16x128xf32>
    tpu.vector_store %arg8[%c0_15, %c0_16], %20 {strides = array<i32>} : memref<16x128xf32, #tpu.memory_space<vmem>>, vector<16x128xf32>,
    return
  }
  func.func @transform_0(%arg0: i32) -> (i32, i32) {
    %c0_i32 = arith.constant 0 : i32
    %c0_i32_0 = arith.constant 0 : i32
    return %arg0, %c0_i32 : i32, i32
  }
  func.func @transform_1(%arg0: i32) -> (i32, i32) {
    %c0_i32 = arith.constant 0 : i32
    %c0_i32_0 = arith.constant 0 : i32
    %c0_i32_1 = arith.constant 0 : i32
    return %c0_i32, %c0_i32_0 : i32, i32
  }
  func.func @transform_2(%arg0: i32) -> (i32, i32) {
    %c0_i32 = arith.constant 0 : i32
    %c0_i32_0 = arith.constant 0 : i32
    %c0_i32_1 = arith.constant 0 : i32
    return %c0_i32, %c0_i32_0 : i32, i32
  }
  func.func @transform_3(%arg0: i32) -> (i32, i32) {
    %c0_i32 = arith.constant 0 : i32
    %c0_i32_0 = arith.constant 0 : i32
    %c0_i32_1 = arith.constant 0 : i32
    return %c0_i32, %c0_i32_0 : i32, i32
  }
  func.func @transform_4(%arg0: i32) -> (i32, i32) {
    %c0_i32 = arith.constant 0 : i32
    %c0_i32_0 = arith.constant 0 : i32
    %c0_i32_1 = arith.constant 0 : i32
    return %c0_i32, %c0_i32_0 : i32, i32
  }
  func.func @transform_5(%arg0: i32) -> (i32, i32) {
    %c0_i32 = arith.constant 0 : i32
    %c0_i32_0 = arith.constant 0 : i32
    %c0_i32_1 = arith.constant 0 : i32
    return %c0_i32, %c0_i32_0 : i32, i32
  }
  func.func @transform_6(%arg0: i32) -> (i32, i32) {
    %c0_i32 = arith.constant 0 : i32
    %c0_i32_0 = arith.constant 0 : i32
    %c0_i32_1 = arith.constant 0 : i32
    return %c0_i32, %c0_i32_0 : i32, i32
  }
  func.func @transform_7(%arg0: i32) -> (i32, i32) {
    %c0_i32 = arith.constant 0 : i32
    %c0_i32_0 = arith.constant 0 : i32
    return %arg0, %c0_i32 : i32, i32
  }
}

</mosaic_0001>

<bundles_post_ra>
// kernel: tpu_custom_call.1
= control target key start
LH: loop header
LB: loop body
LE: loop exit
PB: predicated region body
PF: predicated region fallthrough
CT: control target
= control target key end

     0   :  { %12 = vsyncpa [#allocation3], 0  ;;  %s845_s0 = inlined_call_operand.hbm [shape: bf16[16,128], index: 0, kind: input, shape index: {}]   ;;  %s846_s1 = inlined_call_operand.hbm [shape: bf16[128,256], index: 1, kind: input, shape index: {}]   ;;  %s847_s2 = inlined_call_operand.hbm [shape: f32[1,256], index: 2, kind: input, shape index: {}]   ;;  %s848_s3 = inlined_call_operand.hbm [shape: bf16[128,128], index: 3, kind: input, shape index: {}]   ;;  %s849_s4 = inlined_call_operand.vmem [shape: f32[1,128], index: 4, kind: input, shape index: {}]   ;;  %s850_s5 = inlined_call_operand.hbm [shape: bf16[128,128], index: 5, kind: input, shape index: {}]   ;;  %s851_s6 = inlined_call_operand.vmem [shape: f32[1,128], index: 6, kind: input, shape index: {}]   ;;  %s852_s7 = inlined_call_operand.hbm [shape: f32[16,128], index: 7, kind: output, shape index: {}]  }
   0x1   :  { %13 = vsyncpa [#allocation6], 0 }
   0x2   :  { %14 = vsyncpa [#allocation9], 0  ;;  %s33_s26 = sshll.u32 %s846_s1, 4  ;;  %s34_s26 = int_to_ptr.hbm [resolvable:$true] %s33_s26 }
   0x3   :  { %15 = vsyncpa [#allocation4], 0  ;;  %s761_s27 = smov [#allocation5]   ;;  %s762_s29 = smov 128  }
   0x4   :  { %s35_s28 = sshll.u32 %s761_s27, 4  ;;  %s763_s30 = smov 8   ;;  %s36_s28 = int_to_ptr.vmem [resolvable:$true] %s35_s28 }
   0x5   :  { %41 = dma.hbm_to_vmem [thread:$0]  %s34_s26, 2048, %s36_s28, [#allocation6], %s762_s29, %s762_s29, %s763_s30  }
   0x6   :  { %s57_s10 = sshll.u32 %s848_s3, 4  ;;  %s764_s11 = smov [#allocation8]   ;;  %s58_s10 = int_to_ptr.hbm [resolvable:$true] %s57_s10 }
   0x7   :  { %s59_s12 = sshll.u32 %s764_s11, 4  ;;  %s20_s14 = sshll.u32 %s845_s0, 4  ;;  %s60_s12 = int_to_ptr.vmem [resolvable:$true] %s59_s12  ;;  %s21_s14 = int_to_ptr.hbm [resolvable:$true] %s20_s14 }
   0x8   :  { %s765_s15 = smov 64   ;;  %s766_s16 = smov 4  }
   0x9   :  { %65 = dma.hbm_to_vmem [thread:$0]  %s58_s10, 1024, %s60_s12, [#allocation9], %s765_s15, %s765_s15, %s766_s16  }
   0xa   :  { %s47_s19 = sshll.u32 %s847_s2, 4  ;;  %s767_s20 = smov [#allocation2]   ;;  %s48_s19 = int_to_ptr.hbm [resolvable:$true] %s47_s19 }
   0xb   :  { %s22_s21 = sshll.u32 %s767_s20, 4  ;;  %s768_s3 = smov [#allocation7]   ;;  %s23_s21 = int_to_ptr.vmem [resolvable:$true] %s22_s21 }
   0xc   :  { %28 = dma.hbm_to_vmem [thread:$0]  %s21_s14, 128, %s23_s21, [#allocation3], %s765_s15, %s765_s15, %s766_s16  }
   0xd   :  { %s49_s22 = sshll.u32 %s768_s3, 4  ;;  %s72_s0 = sshll.u32 %s850_s5, 4  ;;  %s50_s22 = int_to_ptr.vmem [resolvable:$true] %s49_s22  ;;  %s73_s0 = int_to_ptr.hbm [resolvable:$true] %s72_s0 }
   0xe   :  { %52 = dma.hbm_to_vmem [thread:$0]  %s48_s19, 32, %s50_s22, [#allocation6]  }
   0xf   :  { %s769_s25 = smov [#allocation10]  }
  0x10   :  { %s74_s26 = sshll.u32 %s769_s25, 4  ;;  %s75_s26 = int_to_ptr.vmem [resolvable:$true] %s74_s26 }
  0x11   :  { %80 = dma.hbm_to_vmem [thread:$0]  %s73_s0, 1024, %s75_s26, [#allocation9], %s765_s15, %s765_s15, %s766_s16  }
  0x12   :  { %753 = dma.done.wait [#allocation3], 128  }
  0x13   :  { %754 = vsyncadd [#allocation3], 4294967168 }
  0x14   :  { %755 = dma.done.wait [#allocation6], 2080  }
  0x15   :  { %756 = vsyncadd [#allocation6], 4294965216 }
  0x16   :  { %757 = dma.done.wait [#allocation9], 2048  }
  0x17   :  { %758 = vsyncadd [#allocation9], 4294965248  ;;  %v494_v0 = vld [vmem:[#allocation5 + $0x70] sm:$0xf]  ;;  %v580_v1 = vld [vmem:[#allocation5 + $0x74] sm:$0xf0] }
  0x18   :  { %v486_v2 = vld [vmem:[#allocation5 + $0x60] sm:$0xf]  ;;  %v495_v3 = vor.u32 %v580_v1, %v494_v0  ;;  %v578_v4 = vld [vmem:[#allocation5 + $0x64] sm:$0xf0]  ;;  %v478_v6 = vld [vmem:[#allocation5 + $0x50] sm:$0xf] }
  0x19   :  { %v487_v5 = vor.u32 %v578_v4, %v486_v2  ;;  %v576_v7 = vld [vmem:[#allocation5 + $0x54] sm:$0xf0]  ;;  %v470_v11 = vld [vmem:[#allocation5 + $0x40] sm:$0xf]  ;;  %v574_v12 = vld [vmem:[#allocation5 + $0x44] sm:$0xf0] }
  0x1a   :  { %213 = vmatpush.bf16.msra.mxu0 %v495_v3  ;;  %v588_v8 = vld [vmem:[#allocation8 + $0x38] sm:$0xff]  ;;  %v479_v9 = vor.u32 %v576_v7, %v478_v6  ;;  %v587_v10 = vld [vmem:[#allocation8 + $0x30] sm:$0xff]  ;;  %v471_v13 = vor.u32 %v574_v12, %v470_v11  ;;  %v586_v14 = vld [vmem:[#allocation8 + $0x28] sm:$0xff]  ;;  %s770_s8 = smov [#allocation11]   ;;  %s417_s11 = sshll.u32 %s852_s7, 4  ;;  %s418_s11 = int_to_ptr.hbm [resolvable:$true] %s417_s11 }
  0x1b   :  { %310 = vmatpush.bf16.msra.mxu2 %v588_v8  ;;  %v462_v15 = vld [vmem:[#allocation5 + $0x30] sm:$0xf]  ;;  %v572_v16 = vld [vmem:[#allocation5 + $0x34] sm:$0xf0]  ;;  %v585_v18 = vld [vmem:[#allocation8 + $0x20] sm:$0xff] }
  0x1c   :  { %v463_v17 = vor.u32 %v572_v16, %v462_v15  ;;  %v454_v19 = vld [vmem:[#allocation5 + $0x20] sm:$0xf]  ;;  %v570_v20 = vld [vmem:[#allocation5 + $0x24] sm:$0xf0]  ;;  %v446_v23 = vld [vmem:[#allocation5 + $0x10] sm:$0xf] }
  0x1d   :  { %v455_v21 = vor.u32 %v570_v20, %v454_v19  ;;  %v584_v22 = vld [vmem:[#allocation8 + $0x18] sm:$0xff]  ;;  %v566_v27 = vld [vmem:[#allocation5 + $0x4] sm:$0xf0]  ;;  %v583_v30 = vld [vmem:[#allocation8 + $0x10] sm:$0xff] }
  0x1e   :  { %214 = vmatpush.bf16.msra.mxu0 %v487_v5  ;;  %v568_v24 = vld [vmem:[#allocation5 + $0x14] sm:$0xf0]  ;;  %v438_v26 = vld [vmem:[#allocation5] sm:$0xf]  ;;  %v582_v31 = vld [vmem:[#allocation8 + $0x8] sm:$0xff] }
  0x1f   :  { %311 = vmatpush.bf16.msra.mxu2 %v587_v10  ;;  %v447_v25 = vor.u32 %v568_v24, %v446_v23  ;;  %v439_v28 = vor.u32 %v566_v27, %v438_v26  ;;  %v829_v29 = vld [vmem:[#allocation2] sm:$0xff]  ;;  %v581_v32 = vld [vmem:[#allocation8] sm:$0xff]  ;;  %v579_v33 = vld [vmem:[#allocation5 + $0x74] sm:$0xf] }
  0x20   :  { %v496_v34 = vld [vmem:[#allocation5 + $0x78] sm:$0xf0]  ;;  %v577_v37 = vld [vmem:[#allocation5 + $0x64] sm:$0xf]  ;;  %v488_v38 = vld [vmem:[#allocation5 + $0x68] sm:$0xf0] }
  0x21   :  { %v596_v35 = vld [vmem:[#allocation10 + $0x38] sm:$0xff]  ;;  %v499_v36 = vor.u32 %v579_v33, %v496_v34  ;;  %v595_v39 = vld [vmem:[#allocation10 + $0x30] sm:$0xff]  ;;  %v491_v40 = vor.u32 %v577_v37, %v488_v38  ;;  %v594_v43 = vld [vmem:[#allocation10 + $0x28] sm:$0xff] }
  0x22   :  { %215 = vmatpush.bf16.msra.mxu0 %v479_v9  ;;  %393 = vmatpush.bf16.msra.mxu3 %v596_v35  ;;  %v575_v41 = vld [vmem:[#allocation5 + $0x54] sm:$0xf]  ;;  %v480_v42 = vld [vmem:[#allocation5 + $0x58] sm:$0xf0]  ;;  %v573_v45 = vld [vmem:[#allocation5 + $0x44] sm:$0xf] }
  0x23   :  { %312 = vmatpush.bf16.msra.mxu2 %v586_v14  ;;  %227 = vmatpush.bf16.msra.mxu1 %v499_v36  ;;  %v483_v44 = vor.u32 %v575_v41, %v480_v42  ;;  %v472_v46 = vld [vmem:[#allocation5 + $0x48] sm:$0xf0]  ;;  %v593_v47 = vld [vmem:[#allocation10 + $0x20] sm:$0xff]  ;;  %v571_v49 = vld [vmem:[#allocation5 + $0x34] sm:$0xf] }
  0x24   :  { %v475_v48 = vor.u32 %v573_v45, %v472_v46  ;;  %v464_v50 = vld [vmem:[#allocation5 + $0x38] sm:$0xf0]  ;;  %v569_v53 = vld [vmem:[#allocation5 + $0x24] sm:$0xf]  ;;  %v456_v54 = vld [vmem:[#allocation5 + $0x28] sm:$0xf0] }
  0x25   :  { %v592_v51 = vld [vmem:[#allocation10 + $0x18] sm:$0xff]  ;;  %v467_v52 = vor.u32 %v571_v49, %v464_v50  ;;  %v459_v56 = vor.u32 %v569_v53, %v456_v54  ;;  %v591_v63 = vld [vmem:[#allocation10 + $0x10] sm:$0xff]  ;;  %v590_v3 = vld [vmem:[#allocation10 + $0x8] sm:$0xff] }
  0x26   :  { %216 = vmatpush.bf16.msra.mxu0 %v471_v13  ;;  %394 = vmatpush.bf16.msra.mxu3 %v595_v39  ;;  %v121_v57 = vld [vmem:[#allocation7] sm:$0x3]  ;;  %v567_v0 = vld [vmem:[#allocation5 + $0x14] sm:$0xf]  ;;  %v448_v1 = vld [vmem:[#allocation5 + $0x18] sm:$0xf0] }
  0x27   :  { %313 = vmatpush.bf16.msra.mxu2 %v585_v18  ;;  %228 = vmatpush.bf16.msra.mxu1 %v491_v40  ;;  %v123_v58 = vperm.slane %v121_v57, 0  ;;  %v451_v2 = vor.u32 %v567_v0, %v448_v1  ;;  %v565_v4 = vld [vmem:[#allocation5 + $0x4] sm:$0xf]  ;;  %v440_v5 = vld [vmem:[#allocation5 + $0x8] sm:$0xf0]  ;;  %v124_v14 = vperm.slane %v121_v57, 1 }
  0x28   :  { %v443_v6 = vor.u32 %v565_v4, %v440_v5  ;;  %v589_v7 = vld [vmem:[#allocation10] sm:$0xff]  ;;  %v607_v9 = vld [vmem:[%s849_s4] ss:$0 sm:$0xff]  ;;  %s415_s4 = sshll.u32 %s770_s8, 4  ;;  %s416_s4 = int_to_ptr.vmem [resolvable:$true] %s415_s4 }
  0x29   :  { %v608_v16 = vld [vmem:[%s851_s6] ss:$0 sm:$0xff] }
  0x2a   :  { %217 = vmatpush.bf16.msra.mxu0 %v463_v17  ;;  %395 = vmatpush.bf16.msra.mxu3 %v594_v43 }
  0x2b   :  { %314 = vmatpush.bf16.msra.mxu2 %v584_v22  ;;  %229 = vmatpush.bf16.msra.mxu1 %v483_v44 }
  0x2e   :  { %218 = vmatpush.bf16.msra.mxu0 %v455_v21  ;;  %396 = vmatpush.bf16.msra.mxu3 %v593_v47 }
  0x2f   :  { %315 = vmatpush.bf16.msra.mxu2 %v583_v30  ;;  %230 = vmatpush.bf16.msra.mxu1 %v475_v48 }
  0x32   :  { %219 = vmatpush.bf16.msra.mxu0 %v447_v25  ;;  %397 = vmatpush.bf16.msra.mxu3 %v592_v51 }
  0x33   :  { %316 = vmatpush.bf16.msra.mxu2 %v582_v31  ;;  %231 = vmatpush.bf16.msra.mxu1 %v467_v52 }
  0x36   :  { %220 = vmatpush.bf16.msra.mxu0 %v439_v28  ;;  %398 = vmatpush.bf16.msra.mxu3 %v591_v63 }
  0x37   :  { %317 = vmatpush.bf16.msra.mxu2 %v581_v32  ;;  %232 = vmatpush.bf16.msra.mxu1 %v459_v56 }
  0x39   :  { %221 = vmatmul.bf16.vlgmr.msra.gmra.mxu0 %v829_v29 }
  0x3a   :  { %399 = vmatpush.bf16.msra.mxu3 %v590_v3 }
  0x3b   :  { %233 = vmatpush.bf16.msra.mxu1 %v451_v2 }
  0x3e   :  { %400 = vmatpush.bf16.msra.mxu3 %v589_v7 }
  0x3f   :  { %234 = vmatpush.bf16.msra.mxu1 %v443_v6 }
  0x42   :  { %235 = vmatmul.bf16.vlgmr.msra.gmra.mxu1 %v829_v29 }
  0xb6   :  { %v222_v55 = vpop.f32.mrf.mxu0 }
  0xb7   :  { %v223_v60 = vadd.f32 %v222_v55, %v123_v58 }
  0xbe   :  { %v224_v59 = vpop.f32.mrf.mxu0 }
  0xbf   :  { %v225_v61 = vadd.f32 %v224_v59, %v123_v58  ;;  %v236_v15 = vpop.f32.mrf.mxu1 }
  0xc0   :  { %v237_v17 = vadd.f32 %v236_v15, %v124_v14 }
  0xc1   :  { %v241_v62 = vpack.c.bf16 %v225_v61, %v223_v60 }
  0xc3   :  { %318 = vmatmul.bf16.vlgmr.msra.gmra.mxu2 %v241_v62 }
  0xc7   :  { %v238_v21 = vpop.f32.mrf.mxu1 }
  0xc8   :  { %v239_v23 = vadd.f32 %v238_v21, %v124_v14 }
 0x146   :  { %v319_v8 = vpop.f32.mrf.mxu2 }
 0x147   :  { %v320_v11 = vadd.f32 %v607_v9, %v319_v8 }
 0x14e   :  { %v321_v10 = vpop.f32.mrf.mxu2 }
 0x14f   :  { %v322_v12 = vadd.f32 %v607_v9, %v321_v10 }
 0x151   :  { %v324_v13 = vpack.c.bf16 %v322_v12, %v320_v11 }
 0x153   :  { %401 = vmatmul.bf16.vlgmr.msra.gmra.mxu3 %v324_v13 }
 0x1d6   :  { %v402_v18 = vpop.f32.mrf.mxu3 }
 0x1d7   :  { %v403_v19 = vadd.f32 %v608_v16, %v402_v18 }
 0x1d9   :  { %v407_v20 = vadd.f32 %v403_v19, %v237_v17 }
 0x1db   :  { %409 = vst [vmem:[#allocation11] sm:$0xff] %v407_v20 }
 0x1de   :  { %v404_v22 = vpop.f32.mrf.mxu3 }
 0x1df   :  { %v405_v24 = vadd.f32 %v608_v16, %v404_v22 }
 0x1e1   :  { %v408_v25 = vadd.f32 %v405_v24, %v239_v23 }
 0x1e3   :  { %410 = vst [vmem:[#allocation11 + $0x8] sm:$0xff] %v408_v25 }
 0x1e4   :  { %423 = dma.vmem_to_hbm [thread:$0]  %s416_s4, 256, %s418_s11, [#allocation4], %s762_s29, %s762_s29, %s763_s30  }
 0x1e5   :  { %759 = dma.done.wait [#allocation4], 256  }
 0x1e6   :  { %760 = vsyncadd [#allocation4], 4294967040 }
 0x1e7   :  { %428 = vsyncpa [#allocation3], 1 }
 0x1e8   :  { %429 = vsyncpa [#allocation6], 1 }
 0x1e9   :  { %430 = vsyncpa [#allocation9], 1 }
 0x1ea   :  { %431 = vsyncpa [#allocation4], 1 }

</bundles_post_ra>
